<compile_context>
chip_gen: v7x
topology: tpu7x:2x2x1
jax: 0.10.0
libtpu: 0.0.40
codegen_flags: <defaults>
</compile_context>

<pallas_src>
import functools

import jax
import jax.numpy as jnp
from jax.experimental import pallas as pl
from jax.experimental.pallas import tpu as pltpu


def _round_up(x, m):
    return ((x + m - 1) // m) * m


def _default_epilogue_dtype():
    """bf16 epilogue on v6e/v7x (bf16 VALU + EUP); f32 elsewhere (v5e, unknown)."""
    try:
        kind = jax.devices()[0].device_kind.lower()
    except Exception:
        return jnp.float32
    if ("v6" in kind) or ("v7" in kind):
        return jnp.bfloat16
    return jnp.float32


# ----------------------------- Pallas kernel -------------------------------

def _mlp_kernel(x_ref, w1_ref, b1_ref, w2_ref, b2_ref, o_ref, *, epi_dtype):
    # x_ref: (TM, H) bf16   w1_ref: (H, F) bf16   b1_ref: (1, F) f32
    # w2_ref: (F, H) bf16   b2_ref: (1, H) f32    o_ref: (TM, H) bf16
    x = x_ref[...]
    # MXU: bf16 inputs, f32 accumulate.
    h = jnp.dot(x.astype(jnp.bfloat16), w1_ref[...],
                preferred_element_type=jnp.float32)
    # Epilogue: bias + tanh-GELU.  epi_dtype is bf16 on v6e/v7x (cheaper VALU,
    # tanh on the EUP), f32 on v5e.  Result already in bf16 feeds the 2nd MXU.
    h = h.astype(epi_dtype) + b1_ref[...].astype(epi_dtype)
    h = jax.nn.gelu(h, approximate=True)
    y = jnp.dot(h.astype(jnp.bfloat16), w2_ref[...],
                preferred_element_type=jnp.float32)
    y = y + b2_ref[...]                       # f32 bias add on the f32 accumulator
    o_ref[...] = y.astype(o_ref.dtype)


def _mlp_pallas(x2d, w1, b1, w2, b2, *, tm=4096):
    """x2d: (M, H) bf16; w1:(H,F) bf16; b1:(1,F) f32; w2:(F,H) bf16; b2:(1,H) f32."""
    M, H = x2d.shape
    F = w1.shape[1]
    out_dtype = x2d.dtype
    epi_dtype = _default_epilogue_dtype()

    # Row tile: multiple of 16 (bf16 sublane packing), large enough to amortize
    # the ~0.35us per-step overhead, but clamped so the grid keeps >=4 steps
    # when M allows (2 per v7x TensorCore).  tm=2048..4096 is the sweet spot.
    target = min(tm, _round_up(M, 16))
    four_way = _round_up(pl.cdiv(M, 4), 16)
    TM = max(16, min(target, four_way))

    grid = (pl.cdiv(M, TM),)                  # partial last block handled by Pallas

    in_b = x2d.dtype.itemsize
    out_b = jnp.dtype(out_dtype).itemsize

    cost = pl.CostEstimate(
        flops=2 * M * (H * F + F * H),
        transcendentals=M * F,                            # tanh in GELU
        bytes_accessed=(M * H * (in_b + out_b)            # x in + y out
                        + (H * F + F * H) * 2             # bf16 weights
                        + (F + H) * 4),                   # f32 biases
    )

    # VMEM budget from actual tile/scratch bytes + headroom (not a hardcoded
    # chip-sized number): double-buffered x/y tiles, resident weights, and the
    # in-kernel f32 accumulators / epi-dtype intermediate.
    io_bytes = 2 * TM * H * (in_b + out_b)
    w_bytes = 2 * ((H * F + F * H) * 2 + (F + H) * 4)
    scratch_bytes = TM * F * 4 + TM * F * jnp.dtype(epi_dtype).itemsize + TM * H * 4
    vmem_limit = 2 * (io_bytes + w_bytes + scratch_bytes) + (4 << 20)
    vmem_limit = int(min(max(vmem_limit, 16 << 20), 48 << 20))

    return pl.pallas_call(
        functools.partial(_mlp_kernel, epi_dtype=epi_dtype),
        out_shape=jax.ShapeDtypeStruct((M, H), out_dtype),
        grid=grid,
        in_specs=[
            pl.BlockSpec((TM, H), lambda i: (i, 0)),   # x: tiled over M
            pl.BlockSpec((H, F), lambda i: (0, 0)),    # w1: grid-invariant
            pl.BlockSpec((1, F), lambda i: (0, 0)),    # b1: grid-invariant
            pl.BlockSpec((F, H), lambda i: (0, 0)),    # w2: grid-invariant
            pl.BlockSpec((1, H), lambda i: (0, 0)),    # b2: grid-invariant
        ],
        out_specs=pl.BlockSpec((TM, H), lambda i: (i, 0)),
        compiler_params=pltpu.CompilerParams(
            dimension_semantics=("parallel",),          # megacore / 2-TC v7x
            vmem_limit_bytes=vmem_limit,
        ),
        cost_estimate=cost,
    )(x2d, w1, b1, w2, b2)


# --------------------------- Inner "model" (JAX) ---------------------------

class TinyMLPModel:
    """Deterministic stand-in for the wrapped model (e.g. Phi-3-V).

    Feature dims are multiples of 128 so every kernel tile is lane-dense.
    Weights are bf16 (MXU-friendly); biases stay f32 (applied after / on top
    of the f32 accumulate)."""

    def __init__(self, hidden=128, ffn=256, seed=0):
        k = jax.random.PRNGKey(seed)
        k1, k2, k3, k4 = jax.random.split(k, 4)
        self.w1 = (jax.random.normal(k1, (hidden, ffn), jnp.float32) * 0.02
                   ).astype(jnp.bfloat16)
        self.b1 = jax.random.normal(k2, (1, ffn), jnp.float32) * 0.02
        self.w2 = (jax.random.normal(k3, (ffn, hidden), jnp.float32) * 0.02
                   ).astype(jnp.bfloat16)
        self.b2 = jax.random.normal(k4, (1, hidden), jnp.float32) * 0.02

    def __call__(self, x):
        # x: (batch, seq, hidden), bf16 activations end-to-end.
        B, S, H = x.shape
        y2d = _mlp_pallas(x.reshape(B * S, H), self.w1, self.b1, self.w2, self.b2)
        return y2d.reshape(B, S, H)


# ----------------------------- ForwardWrapper ------------------------------

class ForwardWrapper:
    """JAX equivalent of the PyTorch ForwardWrapper: pops `num_items_in_batch`
    from kwargs and forwards everything else to the wrapped model."""

    def __init__(self, model):
        self.model = model

    def __call__(self, *args, **kwargs):
        kwargs.pop('num_items_in_batch', None)
        return self.model(*args, **kwargs)


# --------------------------------- Main ------------------------------------

if __name__ == "__main__":
    batch, seq, hidden, ffn = 2, 8, 128, 256
    key = jax.random.PRNGKey(0)
    # bf16 activations produced directly (no extra wrapper-side cast pass).
    x = jax.random.normal(key, (batch, seq, hidden), jnp.bfloat16)

    model = TinyMLPModel(hidden=hidden, ffn=ffn, seed=0)
    wrapper = ForwardWrapper(model)

    # `num_items_in_batch` must be silently dropped by the wrapper.
    out = wrapper(x, num_items_in_batch=batch)
    out = jax.block_until_ready(out)

    assert out.shape == (batch, seq, hidden), out.shape
    assert out.dtype == jnp.bfloat16, out.dtype

    # Plain-JAX reference mirroring the kernel's bf16-in / f32-acc / epi path.
    epi = _default_epilogue_dtype()
    x2d = x.reshape(-1, hidden)
    h_ref = jnp.dot(x2d.astype(jnp.bfloat16), model.w1,
                    preferred_element_type=jnp.float32)
    h_ref = h_ref.astype(epi) + model.b1.astype(epi)
    h_ref = jax.nn.gelu(h_ref, approximate=True)
    y_ref = jnp.dot(h_ref.astype(jnp.bfloat16), model.w2,
                    preferred_element_type=jnp.float32) + model.b2
    ref = y_ref.astype(x.dtype).reshape(batch, seq, hidden)

    err = float(jnp.max(jnp.abs(out.astype(jnp.float32) - ref.astype(jnp.float32))))
    assert err < 2e-2, err

    print("KERNEL_OK")
</pallas_src>

<mosaic_0001>
module attributes {stable_mosaic.version = 11 : i64} {
  func.func @_mlp_kernel(%arg0: i32, %arg1: memref<16x128xbf16, #tpu.memory_space<vmem>>, %arg2: memref<128x256xbf16, #tpu.memory_space<vmem>>, %arg3: memref<1x256xf32, #tpu.memory_space<vmem>>, %arg4: memref<256x128xbf16, #tpu.memory_space<vmem>>, %arg5: memref<1x128xf32, #tpu.memory_space<vmem>>, %arg6: memref<16x128xbf16, #tpu.memory_space<vmem>>) attributes {dimension_semantics = [#tpu.dimension_semantics<parallel>], iteration_bounds = array<i64: 1>, scalar_prefetch = 0 : i64, scratch_operands = 0 : i64, tpu.core_type = #tpu.core_type<tc>, window_params = [{transform_indices = @transform_0, window_bounds = array<i64: 16, 128>}, {pipeline_mode = #tpu.pipeline_mode<synchronous>, transform_indices = @transform_1, window_bounds = array<i64: 128, 256>}, {pipeline_mode = #tpu.pipeline_mode<synchronous>, transform_indices = @transform_2, window_bounds = array<i64: 1, 256>}, {pipeline_mode = #tpu.pipeline_mode<synchronous>, transform_indices = @transform_3, window_bounds = array<i64: 256, 128>}, {pipeline_mode = #tpu.pipeline_mode<synchronous>, transform_indices = @transform_4, window_bounds = array<i64: 1, 128>}, {transform_indices = @transform_5, window_bounds = array<i64: 16, 128>}]} {
    %c0 = arith.constant 0 : index
    %c0_0 = arith.constant 0 : index
    %0 = vector.load %arg1[%c0, %c0_0] : memref<16x128xbf16, #tpu.memory_space<vmem>>, vector<16x128xbf16>
    %c0_1 = arith.constant 0 : index
    %c0_2 = arith.constant 0 : index
    %1 = vector.load %arg2[%c0_1, %c0_2] : memref<128x256xbf16, #tpu.memory_space<vmem>>, vector<128x256xbf16>
    %cst = arith.constant dense<0.000000e+00> : vector<16x256xf32>
    %2 = tpu.matmul %0, %1, %cst {dimension_numbers = #tpu.dot_dimension_numbers<[1], [0], [0], [1], [0, 0, 1, 1], [], []>} : vector<16x128xbf16>, vector<128x256xbf16>, vector<16x256xf32> -> vector<16x256xf32>
    %c0_3 = arith.constant 0 : index
    %c0_4 = arith.constant 0 : index
    %3 = vector.load %arg3[%c0_3, %c0_4] : memref<1x256xf32, #tpu.memory_space<vmem>>, vector<1x256xf32>
    %4 = vector.broadcast %3 : vector<1x256xf32> to vector<16x256xf32>
    %5 = arith.addf %2, %4 : vector<16x256xf32>
    %6 = arith.mulf %5, %5 : vector<16x256xf32>
    %7 = arith.mulf %5, %6 : vector<16x256xf32>
    %cst_5 = arith.constant 4.471500e-02 : f32
    %8 = vector.broadcast %cst_5 : f32 to vector<16x256xf32>
    %9 = arith.mulf %8, %7 : vector<16x256xf32>
    %10 = arith.addf %5, %9 : vector<16x256xf32>
    %cst_6 = arith.constant 0.797884583 : f32
    %11 = vector.broadcast %cst_6 : f32 to vector<16x256xf32>
    %12 = arith.mulf %11, %10 : vector<16x256xf32>
    %13 = math.tanh %12 : vector<16x256xf32>
    %cst_7 = arith.constant 1.000000e+00 : f32
    %14 = vector.broadcast %cst_7 : f32 to vector<16x256xf32>
    %15 = arith.addf %14, %13 : vector<16x256xf32>
    %cst_8 = arith.constant 5.000000e-01 : f32
    %16 = vector.broadcast %cst_8 : f32 to vector<16x256xf32>
    %17 = arith.mulf %16, %15 : vector<16x256xf32>
    %18 = arith.mulf %5, %17 : vector<16x256xf32>
    %19 = arith.truncf %18 : vector<16x256xf32> to vector<16x256xbf16>
    %c0_9 = arith.constant 0 : index
    %c0_10 = arith.constant 0 : index
    %20 = vector.load %arg4[%c0_9, %c0_10] : memref<256x128xbf16, #tpu.memory_space<vmem>>, vector<256x128xbf16>
    %cst_11 = arith.constant dense<0.000000e+00> : vector<16x128xf32>
    %21 = tpu.matmul %19, %20, %cst_11 {dimension_numbers = #tpu.dot_dimension_numbers<[1], [0], [0], [1], [0, 0, 1, 1], [], []>} : vector<16x256xbf16>, vector<256x128xbf16>, vector<16x128xf32> -> vector<16x128xf32>
    %c0_12 = arith.constant 0 : index
    %c0_13 = arith.constant 0 : index
    %22 = vector.load %arg5[%c0_12, %c0_13] : memref<1x128xf32, #tpu.memory_space<vmem>>, vector<1x128xf32>
    %23 = vector.broadcast %22 : vector<1x128xf32> to vector<16x128xf32>
    %24 = arith.addf %21, %23 : vector<16x128xf32>
    %25 = arith.truncf %24 : vector<16x128xf32> to vector<16x128xbf16>
    %c0_14 = arith.constant 0 : index
    %c0_15 = arith.constant 0 : index
    %26 = vector.load %arg6[%c0_14, %c0_15] : memref<16x128xbf16, #tpu.memory_space<vmem>>, vector<16x128xbf16>
    tpu.vector_store %arg6[%c0_14, %c0_15], %25 {strides = array<i32>} : memref<16x128xbf16, #tpu.memory_space<vmem>>, vector<16x128xbf16>,
    return
  }
  func.func @transform_0(%arg0: i32) -> (i32, i32) {
    %c0_i32 = arith.constant 0 : i32
    %c0_i32_0 = arith.constant 0 : i32
    return %arg0, %c0_i32 : i32, i32
  }
  func.func @transform_1(%arg0: i32) -> (i32, i32) {
    %c0_i32 = arith.constant 0 : i32
    %c0_i32_0 = arith.constant 0 : i32
    %c0_i32_1 = arith.constant 0 : i32
    return %c0_i32, %c0_i32_0 : i32, i32
  }
  func.func @transform_2(%arg0: i32) -> (i32, i32) {
    %c0_i32 = arith.constant 0 : i32
    %c0_i32_0 = arith.constant 0 : i32
    %c0_i32_1 = arith.constant 0 : i32
    return %c0_i32, %c0_i32_0 : i32, i32
  }
  func.func @transform_3(%arg0: i32) -> (i32, i32) {
    %c0_i32 = arith.constant 0 : i32
    %c0_i32_0 = arith.constant 0 : i32
    %c0_i32_1 = arith.constant 0 : i32
    return %c0_i32, %c0_i32_0 : i32, i32
  }
  func.func @transform_4(%arg0: i32) -> (i32, i32) {
    %c0_i32 = arith.constant 0 : i32
    %c0_i32_0 = arith.constant 0 : i32
    %c0_i32_1 = arith.constant 0 : i32
    return %c0_i32, %c0_i32_0 : i32, i32
  }
  func.func @transform_5(%arg0: i32) -> (i32, i32) {
    %c0_i32 = arith.constant 0 : i32
    %c0_i32_0 = arith.constant 0 : i32
    return %arg0, %c0_i32 : i32, i32
  }
}

</mosaic_0001>

<bundles_post_ra>
// kernel: tpu_custom_call.1
= control target key start
LH: loop header
LB: loop body
LE: loop exit
PB: predicated region body
PF: predicated region fallthrough
CT: control target
= control target key end

     0   :  { %10 = vsyncpa [#allocation3], 0  ;;  %s783_s0 = inlined_call_operand.hbm [shape: bf16[16,128], index: 0, kind: input, shape index: {}]   ;;  %s784_s1 = inlined_call_operand.hbm [shape: bf16[128,256], index: 1, kind: input, shape index: {}]   ;;  %s785_s2 = inlined_call_operand.vmem [shape: f32[1,256], index: 2, kind: input, shape index: {}]   ;;  %s786_s3 = inlined_call_operand.hbm [shape: bf16[256,128], index: 3, kind: input, shape index: {}]   ;;  %s787_s4 = inlined_call_operand.vmem [shape: f32[1,128], index: 4, kind: input, shape index: {}]   ;;  %s788_s5 = inlined_call_operand.hbm [shape: bf16[16,128], index: 5, kind: output, shape index: {}]  }
   0x1   :  { %11 = vsyncpa [#allocation6], 0 }
   0x2   :  { %12 = vsyncpa [#allocation4], 0  ;;  %s681_s18 = smov [#allocation5]   ;;  %s587_s22 = scalar_lea.hbm %s784_s1, 2048 }
   0x3   :  { %s30_s19 = sshll.u32 %s681_s18, 4  ;;  %p588_p0 = scmp.ne.s32.totalorder %s784_s1, %s587_s22  ;;  %s31_s19 = int_to_ptr.vmem [resolvable:$true] %s30_s19 }
   0x4   :  { %p591_p1 = scmp.lt.u32.totalorder %s587_s22, %s784_s1 }
   0x6   :  { %p593_p2 = pnand %p591_p1, %p588_p0 }
   0x8   :  { %596 = shalt.err (!%p593_p2)
}
   0x9   :  { %s597_s27 = scalar_lea.vmem %s31_s19, 2048  ;;  %p602_p4 = scmp.lt.s32.totalorder %s31_s19, %s31_s19 }
   0xa   :  { %p598_p3 = scmp.ne.s32.totalorder %s31_s19, %s597_s27  ;;  %p603_p5 = scmp.lt.s32.totalorder %s597_s27, %s597_s27 }
   0xc   :  { %p604_p6 = por %p603_p5, %p602_p4 }
   0xe   :  { %p605_p7 = pnand %p604_p6, %p598_p3 }
  0x10   :  { %608 = shalt.err (!%p605_p7)
}
  0x11   :  { %s682_s28 = smov 128   ;;  %s683_s29 = smov 8  }
  0x12   :  { %36 = dma.hbm_to_vmem [thread:$0]  %s784_s1, 2048, %s31_s19, [#allocation6], %s682_s28, %s682_s28, %s683_s29  }
  0x13   :  { %s684_s7 = smov [#allocation2]   ;;  %s609_s11 = scalar_lea.hbm %s783_s0, 128 }
  0x14   :  { %s18_s8 = sshll.u32 %s684_s7, 4  ;;  %p610_p8 = scmp.ne.s32.totalorder %s783_s0, %s609_s11  ;;  %s19_s8 = int_to_ptr.vmem [resolvable:$true] %s18_s8 }
  0x15   :  { %p613_p9 = scmp.lt.u32.totalorder %s609_s11, %s783_s0 }
  0x17   :  { %p615_p10 = pnand %p613_p9, %p610_p8 }
  0x19   :  { %618 = shalt.err (!%p615_p10)
}
  0x1a   :  { %s619_s16 = scalar_lea.vmem %s19_s8, 128  ;;  %p624_p12 = scmp.lt.s32.totalorder %s19_s8, %s19_s8 }
  0x1b   :  { %p620_p11 = scmp.ne.s32.totalorder %s19_s8, %s619_s16  ;;  %p625_p13 = scmp.lt.s32.totalorder %s619_s16, %s619_s16 }
  0x1d   :  { %p626_p0 = por %p625_p13, %p624_p12 }
  0x1f   :  { %p627_p1 = pnand %p626_p0, %p620_p11 }
  0x21   :  { %630 = shalt.err (!%p627_p1)
}
  0x22   :  { %s685_s1 = smov 64   ;;  %s686_s17 = smov 4  }
  0x23   :  { %24 = dma.hbm_to_vmem [thread:$0]  %s783_s0, 128, %s19_s8, [#allocation3], %s685_s1, %s685_s1, %s686_s17  }
  0x24   :  { %s687_s20 = smov [#allocation7]   ;;  %s631_s24 = scalar_lea.hbm %s786_s3, 2048 }
  0x25   :  { %s44_s21 = sshll.u32 %s687_s20, 4  ;;  %p632_p2 = scmp.ne.s32.totalorder %s786_s3, %s631_s24  ;;  %s45_s21 = int_to_ptr.vmem [resolvable:$true] %s44_s21 }
  0x26   :  { %p635_p3 = scmp.lt.u32.totalorder %s631_s24, %s786_s3 }
  0x28   :  { %p637_p4 = pnand %p635_p3, %p632_p2 }
  0x2a   :  { %640 = shalt.err (!%p637_p4)
}
  0x2b   :  { %s641_s29 = scalar_lea.vmem %s45_s21, 2048  ;;  %p646_p6 = scmp.lt.s32.totalorder %s45_s21, %s45_s21 }
  0x2c   :  { %p642_p5 = scmp.ne.s32.totalorder %s45_s21, %s641_s29  ;;  %p647_p7 = scmp.lt.s32.totalorder %s641_s29, %s641_s29 }
  0x2e   :  { %p648_p8 = por %p647_p7, %p646_p6 }
  0x30   :  { %p649_p9 = pnand %p648_p8, %p642_p5 }
  0x32   :  { %652 = shalt.err (!%p649_p9)
}
  0x33   :  { %50 = dma.hbm_to_vmem [thread:$0]  %s786_s3, 2048, %s45_s21, [#allocation6], %s685_s1, %s685_s1, %s686_s17  }
  0x34   :  { %675 = dma.done.wait [#allocation3], 128  }
  0x35   :  { %676 = vsyncadd [#allocation3], 4294967168 }
  0x36   :  { %677 = dma.done.wait [#allocation6], 4096  }
  0x37   :  { %678 = vsyncadd [#allocation6], 4294963200  ;;  %v688_v0 = vmov 0   ;;  %v538_v1 = vld [vmem:[#allocation5 + $0x4] ss:$8 sps:$4 sm:$0xff]   ;;  %v562_v17 = vld [vmem:[#allocation2] sm:$0xff]   ;;  %v83_v34 = vlaneseq }
  0x38   :  { %211 = vmatprep.mubr.bf16.mxu0 %v688_v0  ;;  %v540_v2 = vld [vmem:[#allocation5] ss:$8 sps:$4 sm:$0xff]   ;;  %179 = vmatprep.subr.bf16.mxu0 %v538_v1  ;;  %v541_v3 = vld [vmem:[#allocation5 + $0x14] ss:$8 sps:$4 sm:$0xff]   ;;  %v543_v4 = vld [vmem:[#allocation5 + $0x10] ss:$8 sps:$4 sm:$0xff]  }
  0x39   :  { %180 = vmatpush1.bf16.msra.mxu0 %v540_v2  ;;  %v544_v5 = vld [vmem:[#allocation5 + $0x24] ss:$8 sps:$4 sm:$0xff]   ;;  %v546_v6 = vld [vmem:[#allocation5 + $0x20] ss:$8 sps:$4 sm:$0xff]   ;;  %v547_v7 = vld [vmem:[#allocation5 + $0x34] ss:$8 sps:$4 sm:$0xff]  }
  0x3a   :  { %181 = vmatprep.subr.bf16.mxu0 %v541_v3  ;;  %v549_v8 = vld [vmem:[#allocation5 + $0x30] ss:$8 sps:$4 sm:$0xff]   ;;  %v550_v9 = vld [vmem:[#allocation5 + $0x44] ss:$8 sps:$4 sm:$0xff]   ;;  %v552_v10 = vld [vmem:[#allocation5 + $0x40] ss:$8 sps:$4 sm:$0xff]  }
  0x3b   :  { %v553_v11 = vld [vmem:[#allocation5 + $0x54] ss:$8 sps:$4 sm:$0xff]   ;;  %v555_v12 = vld [vmem:[#allocation5 + $0x50] ss:$8 sps:$4 sm:$0xff]   ;;  %v556_v13 = vld [vmem:[#allocation5 + $0x64] ss:$8 sps:$4 sm:$0xff]  }
  0x3c   :  { %v558_v14 = vld [vmem:[#allocation5 + $0x60] ss:$8 sps:$4 sm:$0xff]   ;;  %v559_v15 = vld [vmem:[#allocation5 + $0x74] ss:$8 sps:$4 sm:$0xff]   ;;  %v561_v16 = vld [vmem:[#allocation5 + $0x70] ss:$8 sps:$4 sm:$0xff]  }
  0x3d   :  { %182 = vmatpush1.bf16.msra.mxu0 %v543_v4  ;;  %v563_v18 = vld [vmem:[#allocation7 + $0x40] sm:$0xff]   ;;  %v565_v20 = vld [vmem:[#allocation7 + $0x48] sm:$0xff]   ;;  %v567_v22 = vld [vmem:[#allocation7 + $0x50] sm:$0xff]   ;;  %v84_v35 = vshrl.u32 %v83_v34, 7  ;;  %s689_s8 = smov [#allocation8]  }
  0x3e   :  { %183 = vmatprep.subr.bf16.mxu0 %v544_v5  ;;  %v564_v19 = vld [vmem:[#allocation7] sm:$0xff]   ;;  %507 = vmatprep.subr.bf16.mxu1 %v563_v18  ;;  %v566_v21 = vld [vmem:[#allocation7 + $0x8] sm:$0xff]   ;;  %v568_v23 = vld [vmem:[#allocation7 + $0x10] sm:$0xff]   ;;  %s451_s9 = sshll.u32 %s689_s8, 4  ;;  %s452_s9 = int_to_ptr.vmem [resolvable:$true] %s451_s9 }
  0x3f   :  { %508 = vmatpush3.bf16.msra.mxu1 %v564_v19  ;;  %v569_v24 = vld [vmem:[#allocation7 + $0x58] sm:$0xff]   ;;  %v571_v26 = vld [vmem:[#allocation7 + $0x60] sm:$0xff]   ;;  %v573_v28 = vld [vmem:[#allocation7 + $0x68] sm:$0xff]   ;;  %v85_v36 = vsub.s32 0, %v84_v35  ;;  %v89_v38 = vsub.s32 1, %v84_v35  ;;  %s653_s10 = scalar_lea.vmem %s452_s9, 128  ;;  %p658_p11 = scmp.lt.s32.totalorder %s452_s9, %s452_s9 }
  0x40   :  { %509 = vmatprep.subr.bf16.mxu1 %v565_v20  ;;  %v570_v25 = vld [vmem:[#allocation7 + $0x18] sm:$0xff]   ;;  %v572_v27 = vld [vmem:[#allocation7 + $0x20] sm:$0xff]   ;;  %v574_v29 = vld [vmem:[#allocation7 + $0x28] sm:$0xff]   ;;  %p654_p10 = scmp.ne.s32.totalorder %s452_s9, %s653_s10  ;;  %p659_p12 = scmp.lt.s32.totalorder %s653_s10, %s653_s10 }
  0x41   :  { %184 = vmatpush1.bf16.msra.mxu0 %v546_v6  ;;  %v575_v30 = vld [vmem:[#allocation7 + $0x70] sm:$0xff]   ;;  %v577_v32 = vld [vmem:[#allocation7 + $0x78] sm:$0xff]  }
  0x42   :  { %185 = vmatprep.subr.bf16.mxu0 %v547_v7  ;;  %v576_v31 = vld [vmem:[#allocation7 + $0x30] sm:$0xff]   ;;  %v578_v33 = vld [vmem:[#allocation7 + $0x38] sm:$0xff]   ;;  %p660_p13 = por %p659_p12, %p658_p11 }
  0x43   :  { %510 = vmatpush3.bf16.msra.mxu1 %v566_v21  ;;  %v81_v37 = vld [vmem:[%s785_s2] sm:$0x3] }
  0x44   :  { %511 = vmatprep.subr.bf16.mxu1 %v567_v22  ;;  %v86_v39 = vrot.slane %v81_v37, %v85_v36  ;;  %v90_v40 = vrot.slane %v81_v37, %v89_v38  ;;  %p661_p0 = pnand %p660_p13, %p654_p10 }
  0x45   :  { %186 = vmatpush1.bf16.msra.mxu0 %v549_v8 }
  0x46   :  { %187 = vmatprep.subr.bf16.mxu0 %v550_v9 }
  0x47   :  { %512 = vmatpush3.bf16.msra.mxu1 %v568_v23 }
  0x48   :  { %513 = vmatprep.subr.bf16.mxu1 %v569_v24 }
  0x49   :  { %188 = vmatpush1.bf16.msra.mxu0 %v552_v10 }
  0x4a   :  { %189 = vmatprep.subr.bf16.mxu0 %v553_v11 }
  0x4b   :  { %514 = vmatpush3.bf16.msra.mxu1 %v570_v25 }
  0x4c   :  { %515 = vmatprep.subr.bf16.mxu1 %v571_v26 }
  0x4d   :  { %190 = vmatpush1.bf16.msra.mxu0 %v555_v12 }
  0x4e   :  { %191 = vmatprep.subr.bf16.mxu0 %v556_v13 }
  0x4f   :  { %516 = vmatpush3.bf16.msra.mxu1 %v572_v27  ;;  %v481_v27 = vld [vmem:[%s787_s4] ss:$0 sm:$0xff] }
  0x50   :  { %517 = vmatprep.subr.bf16.mxu1 %v573_v28 }
  0x51   :  { %192 = vmatpush1.bf16.msra.mxu0 %v558_v14 }
  0x52   :  { %193 = vmatprep.subr.bf16.mxu0 %v559_v15 }
  0x53   :  { %518 = vmatpush3.bf16.msra.mxu1 %v574_v29 }
  0x54   :  { %519 = vmatprep.subr.bf16.mxu1 %v575_v30 }
  0x55   :  { %194 = vmatpush1.bf16.msra.mxu0 %v561_v16 }
  0x57   :  { %520 = vmatpush3.bf16.msra.mxu1 %v576_v31 }
  0x58   :  { %212 = vmatmul.mubr.bf16.vlgmr.msra.gmra.mrb[0].mxu0 %v562_v17  ;;  %521 = vmatprep.subr.bf16.mxu1 %v577_v32 }
  0x5b   :  { %522 = vmatpush3.bf16.msra.mxu1 %v578_v33 }
 0x12b   :  { %v213_v41 = vpop.f32.mrb[0].mxu0 }
 0x12c   :  { %v214_v42 = vadd.f32 %v213_v41, %v86_v39  ;;  %v215_v43 = vpop.f32.mrb[1].mxu0 }
 0x12d   :  { %v216_v44 = vadd.f32 %v215_v43, %v90_v40  ;;  %v217_v45 = vpop.f32.mrb[2].mxu0 }
 0x12e   :  { %v222_v46 = vmul.f32 %v214_v42, %v214_v42  ;;  %v218_v47 = vadd.f32 %v217_v45, %v86_v39  ;;  %v219_v48 = vpop.f32.mrb[3].mxu0 }
 0x12f   :  { %v223_v49 = vmul.f32 %v216_v44, %v216_v44  ;;  %v220_v50 = vadd.f32 %v219_v48, %v90_v40 }
 0x130   :  { %v226_v51 = vmul.f32 %v222_v46, %v214_v42  ;;  %v224_v52 = vmul.f32 %v218_v47, %v218_v47 }
 0x131   :  { %v227_v53 = vmul.f32 %v223_v49, %v216_v44  ;;  %v225_v54 = vmul.f32 %v220_v50, %v220_v50 }
 0x132   :  { %v230_v55 = vmul.f32 0.044715, %v226_v51  ;;  %v228_v56 = vmul.f32 %v224_v52, %v218_v47 }
 0x133   :  { %v231_v57 = vmul.f32 0.044715, %v227_v53  ;;  %v229_v58 = vmul.f32 %v225_v54, %v220_v50 }
 0x134   :  { %v234_v59 = vadd.f32 %v230_v55, %v214_v42  ;;  %v232_v60 = vmul.f32 0.044715, %v228_v56 }
 0x135   :  { %v233_v61 = vmul.f32 0.044715, %v229_v58  ;;  %v235_v62 = vadd.f32 %v231_v57, %v216_v44 }
 0x136   :  { %v238_v63 = vmul.f32 0.7978846, %v234_v59  ;;  %v236_v0 = vadd.f32 %v232_v60, %v218_v47 }
 0x137   :  { %v237_v1 = vadd.f32 %v233_v61, %v220_v50  ;;  %v239_v2 = vmul.f32 0.7978846, %v235_v62 }
 0x138   :  { %579 = vtanh.f32 %v238_v63  ;;  %v240_v3 = vmul.f32 0.7978846, %v236_v0 }
 0x139   :  { %v241_v4 = vmul.f32 0.7978846, %v237_v1  ;;  %581 = vtanh.f32 %v239_v2 }
 0x13a   :  { %583 = vtanh.f32 %v240_v3 }
 0x13b   :  { %585 = vtanh.f32 %v241_v4 }
 0x142   :  { %v580_v5 = vpop.eup %579 }
 0x143   :  { %v582_v6 = vpop.eup %581  ;;  %v246_v7 = vadd.f32 1.0, %v580_v5 }
 0x144   :  { %v584_v8 = vpop.eup %583  ;;  %v247_v9 = vadd.f32 1.0, %v582_v6 }
 0x145   :  { %v586_v10 = vpop.eup %585  ;;  %v248_v11 = vadd.f32 1.0, %v584_v8  ;;  %v250_v12 = vmul.f32 0.5, %v246_v7 }
 0x146   :  { %v249_v13 = vadd.f32 1.0, %v586_v10  ;;  %v251_v14 = vmul.f32 0.5, %v247_v9 }
 0x147   :  { %v252_v15 = vmul.f32 0.5, %v248_v11  ;;  %v254_v17 = vmul.f32 %v250_v12, %v214_v42 }
 0x148   :  { %v253_v16 = vmul.f32 0.5, %v249_v13  ;;  %v255_v19 = vmul.f32 %v251_v14, %v216_v44 }
 0x149   :  { %v256_v18 = vmul.f32 %v252_v15, %v218_v47 }
 0x14a   :  { %v257_v20 = vmul.f32 %v253_v16, %v220_v50 }
 0x14b   :  { %v258_v21 = vpack.c.bf16 %v256_v18, %v254_v17 }
 0x14c   :  { %v259_v22 = vpack.c.bf16 %v257_v20, %v255_v19 }
 0x14e   :  { %427 = vmatprep.mubr.bf16.mxu1 %v259_v22 }
 0x14f   :  { %428 = vmatmul.mubr.bf16.vlgmr.msra.gmra.mrb[0].mxu1 %v258_v21 }
 0x222   :  { %v523_v23 = vpop.f32.mrb[0].mxu1 }
 0x223   :  { %v524_v24 = vpop.f32.mrb[1].mxu1 }
 0x224   :  { %v525_v25 = vadd.f32 %v524_v24, %v523_v23  ;;  %v526_v26 = vpop.f32.mrb[2].mxu1 }
 0x225   :  { %v527_v28 = vpop.f32.mrb[3].mxu1 }
 0x226   :  { %v528_v29 = vadd.f32 %v527_v28, %v526_v26  ;;  %v430_v30 = vadd.f32 %v525_v25, %v481_v27 }
 0x228   :  { %v433_v31 = vadd.f32 %v528_v29, %v481_v27 }
 0x22a   :  { %v505_v32 = vpack.c.bf16 %v433_v31, %v430_v30 }
 0x22c   :  { %506 = vst [vmem:[#allocation8] sm:$0xff] %v505_v32  }
 0x22d   :  { %664 = shalt.err (!%p661_p0)
}
 0x22e   :  { %s665_s4 = scalar_lea.hbm %s788_s5, 128 }
 0x22f   :  { %p666_p1 = scmp.ne.s32.totalorder %s788_s5, %s665_s4  ;;  %p669_p2 = scmp.lt.u32.totalorder %s665_s4, %s788_s5 }
 0x231   :  { %p671_p3 = pnand %p669_p2, %p666_p1 }
 0x233   :  { %674 = shalt.err (!%p671_p3)
}
 0x234   :  { %457 = dma.vmem_to_hbm [thread:$0]  %s452_s9, 128, %s788_s5, [#allocation4], %s685_s1, %s685_s1, %s686_s17  }
 0x235   :  { %679 = dma.done.wait [#allocation4], 128  }
 0x236   :  { %680 = vsyncadd [#allocation4], 4294967168 }
 0x237   :  { %461 = vsyncpa [#allocation3], 1 }
 0x238   :  { %462 = vsyncpa [#allocation6], 1 }
 0x239   :  { %463 = vsyncpa [#allocation4], 1 }

</bundles_post_ra>
